<compile_context>
chip_gen: v7x
topology: tpu7x:2x2x1
jax: 0.10.0
libtpu: 0.0.40
codegen_flags: <defaults>
</compile_context>

<pallas_src>
import jax
import jax.numpy as jnp
import numpy as np
from jax.experimental import pallas as pl
from jax.experimental.pallas import tpu as pltpu

EPS = 1e-5  # PyTorch BatchNorm2d default eps


def double_conv_kernel(x_ref, w1b_ref, w2b_ref, fold_ref, bcast_ref,
                       g1_ref, be1_ref, g2_ref, be2_ref,
                       out_ref, cat1_ref, cat2_ref):
    """Single grid point; everything resident in VMEM (small shapes).

    x_ref    : (N, H, W*Cin)  f32     NHWC input with (w, c) flattened into lanes
    w1b_ref  : (3*W*Cin,  W*Cout) bf16  banded conv1 weights, 3 dy-taps concatenated along K
    w2b_ref  : (3*W*Cout, W*Cout) bf16  banded conv2 weights
    fold_ref : (W*Cout, Cout) f32     lane-interleaved -> per-channel summing matrix
    bcast_ref: (Cout, W*Cout) f32     per-channel -> lane-interleaved broadcast matrix
    g*,be*   : (1, Cout)      f32     BatchNorm gamma / beta
    out_ref  : (N*H, W*Cout)  f32     lane-dense output slab (W*Cout == 128 here)
    cat*_ref : (N, H, 3*W*C)  f32     3-tap matmul operand scratch (im2row along H only)
    """
    N, H, K1 = x_ref.shape
    NH = N * H
    WCout = out_ref.shape[-1]
    Cout = fold_ref.shape[-1]
    W = WCout // Cout
    inv_m = 1.0 / float(NH * W)          # 1 / (N*H*W) elements per channel

    def build_taps(dst_ref, src, K):
        # dst lanes [dy*K:(dy+1)*K] hold input row h+dy-1 for output row h ('same' zero
        # padding along H); the column (W) halo is folded into the banded weights.
        zrow = jnp.zeros((N, 1, K), src.dtype)
        dst_ref[:, :, K:2 * K] = src                         # dy=1: centre row (aligned copy)
        dst_ref[:, 0:1, 0:K] = zrow                          # dy=0: row above, top halo = 0
        dst_ref[:, 1:, 0:K] = src[:, :H - 1, :]
        dst_ref[:, H - 1:H, 2 * K:3 * K] = zrow              # dy=2: row below, bottom halo = 0
        dst_ref[:, :H - 1, 2 * K:3 * K] = src[:, 1:, :]

    def bn_relu(acc, g_ref, be_ref):
        # Training-mode BatchNorm with single-pass batch stats (biased variance) + ReLU.
        s1 = jnp.sum(acc, axis=0, keepdims=True)                        # (1, W*Cout)
        s2 = jnp.sum(acc * acc, axis=0, keepdims=True)                  # (1, W*Cout)
        stats = jnp.concatenate([s1, s2], axis=0)                       # (2, W*Cout)
        ch = jnp.dot(stats, fold_ref[...],
                     preferred_element_type=jnp.float32)                # (2, Cout)
        mean = ch[0:1] * inv_m
        var = jnp.maximum(ch[1:2] * inv_m - mean * mean, 0.0)
        scale = g_ref[...] * jax.lax.rsqrt(var + EPS)                   # (1, Cout)
        shift = be_ref[...] - mean * scale
        ss = jnp.concatenate([scale, shift], axis=0)                    # (2, Cout)
        ss_t = jnp.dot(ss, bcast_ref[...],
                       preferred_element_type=jnp.float32)              # (2, W*Cout)
        return jnp.maximum(acc * ss_t[0:1] + ss_t[1:2], 0.0)            # BN affine + ReLU

    # ---- conv1: stage 3 row-taps once, single bf16 matmul with K = 3*W*Cin.
    build_taps(cat1_ref, x_ref[...], K1)
    acc1 = jnp.dot(cat1_ref[...].reshape(NH, 3 * K1).astype(jnp.bfloat16),
                   w1b_ref[...], preferred_element_type=jnp.float32)    # (N*H, W*Cout)
    y1 = bn_relu(acc1, g1_ref, be1_ref)

    # ---- conv2: y1 goes straight into cat2's tap bands (no intermediate staging copy).
    build_taps(cat2_ref, y1.reshape(N, H, WCout), WCout)
    acc2 = jnp.dot(cat2_ref[...].reshape(NH, 3 * WCout).astype(jnp.bfloat16),
                   w2b_ref[...], preferred_element_type=jnp.float32)
    out_ref[...] = bn_relu(acc2, g2_ref, be2_ref).astype(out_ref.dtype)  # full 128-lane stores


def _banded_conv_weights(w, W, dtype=jnp.bfloat16):
    """(3,3,Cin,Cout) conv taps -> (3*W*Cin, W*Cout) block-banded matrix (dy-taps along K).

    Row index = dy*(W*Cin) + wi*Cin + c; column index = wo*Cout + o.  Only taps with
    wi == wo + dx - 1 inside the image are kept == 'same' zero padding along W.
    """
    KH, KW, Cin, Cout = w.shape
    wi = np.arange(W)[:, None]
    wo = np.arange(W)[None, :]
    sel = np.stack([(wi == wo + dx - 1) for dx in range(KW)], axis=0).astype(np.float32)
    wb = jnp.einsum("xim,yxco->yicmo", jnp.asarray(sel), jnp.asarray(w, jnp.float32))
    return wb.reshape(KH * W * Cin, W * Cout).astype(dtype)


def _vmem_bytes(shape, dtype):
    """Rough tile-padded VMEM footprint of one array."""
    item = jnp.dtype(dtype).itemsize
    sub = {4: 8, 2: 16, 1: 32}[item]
    s = (1, 1) + tuple(shape)
    lead = int(np.prod(s[:-2]))
    return lead * (-(-s[-2] // sub) * sub) * (-(-s[-1] // 128) * 128) * item


def inconv_forward(x_nchw, params):
    """PyTorch-equivalent forward of inconv(in_ch, out_ch); input/output are NCHW."""
    N, Cin, H, W = x_nchw.shape
    Cout = params["w1"].shape[-1]
    K1, K2 = W * Cin, W * Cout

    # TODO(synk): keep the model NHWC end-to-end in production to drop these transposes.
    x = jnp.transpose(x_nchw, (0, 2, 3, 1)).reshape(N, H, K1)

    w1b = _banded_conv_weights(params["w1"], W)                           # (3*W*Cin,  W*Cout) bf16
    w2b = _banded_conv_weights(params["w2"], W)                           # (3*W*Cout, W*Cout) bf16
    fold = jnp.asarray(np.tile(np.eye(Cout, dtype=np.float32), (W, 1)))   # (W*Cout, Cout)
    bcast = fold.T                                                        # (Cout, W*Cout)

    # NOTE: params["b1"] / params["b2"] (conv biases) are intentionally not passed: under
    # batch-statistics BatchNorm the bias cancels exactly in the forward pass.
    operands = [x, w1b, w2b, fold, bcast,
                params["g1"], params["be1"], params["g2"], params["be2"]]
    scratch = [((N, H, 3 * K1), jnp.float32), ((N, H, 3 * K2), jnp.float32)]
    out_sd = jax.ShapeDtypeStruct((N * H, K2), jnp.float32)

    footprint = sum(_vmem_bytes(a.shape, a.dtype) for a in operands)
    footprint += sum(_vmem_bytes(s, d) for s, d in scratch)
    footprint += _vmem_bytes(out_sd.shape, out_sd.dtype)
    vmem_limit = int(min(max(2 * footprint + (1 << 20), 4 << 20), 100 << 20))

    vmem = pl.BlockSpec(memory_space=pltpu.MemorySpace.VMEM)
    out = pl.pallas_call(
        double_conv_kernel,
        out_shape=out_sd,
        in_specs=[vmem] * len(operands),
        out_specs=vmem,
        scratch_shapes=[pltpu.VMEM(s, d) for s, d in scratch],
        compiler_params=pltpu.CompilerParams(vmem_limit_bytes=vmem_limit),
    )(*operands)

    # (N*H, W*Cout) -> (N, H, W, Cout) -> NCHW
    return jnp.transpose(out.reshape(N, H, W, Cout), (0, 3, 1, 2))


def ref_forward(x_nchw, p):
    """Pure-JAX f32 reference (mirrors the PyTorch module, training-mode BN)."""
    def conv(x, w, b):
        w_oihw = jnp.transpose(w, (3, 2, 0, 1))
        y = jax.lax.conv_general_dilated(
            x, w_oihw, window_strides=(1, 1), padding="SAME",
            dimension_numbers=("NCHW", "OIHW", "NCHW"))
        return y + b.reshape(1, -1, 1, 1)

    def bn_relu(y, g, be):
        mean = jnp.mean(y, axis=(0, 2, 3), keepdims=True)
        var = jnp.var(y, axis=(0, 2, 3), keepdims=True)
        yn = (y - mean) / jnp.sqrt(var + EPS)
        return jnp.maximum(yn * g.reshape(1, -1, 1, 1) + be.reshape(1, -1, 1, 1), 0.0)

    y = bn_relu(conv(x_nchw, p["w1"], p["b1"][0]), p["g1"][0], p["be1"][0])
    y = bn_relu(conv(y, p["w2"], p["b2"][0]), p["g2"][0], p["be2"][0])
    return y


if __name__ == "__main__":
    N, Cin, Cout, H, W = 2, 4, 8, 16, 16

    key = jax.random.PRNGKey(0)
    ks = jax.random.split(key, 10)
    params = {
        "w1": 0.1 * jax.random.normal(ks[0], (3, 3, Cin, Cout), jnp.float32),
        "b1": 0.1 * jax.random.normal(ks[1], (1, Cout), jnp.float32),
        "g1": 1.0 + 0.1 * jax.random.normal(ks[2], (1, Cout), jnp.float32),
        "be1": 0.1 * jax.random.normal(ks[3], (1, Cout), jnp.float32),
        "w2": 0.1 * jax.random.normal(ks[4], (3, 3, Cout, Cout), jnp.float32),
        "b2": 0.1 * jax.random.normal(ks[5], (1, Cout), jnp.float32),
        "g2": 1.0 + 0.1 * jax.random.normal(ks[6], (1, Cout), jnp.float32),
        "be2": 0.1 * jax.random.normal(ks[7], (1, Cout), jnp.float32),
    }
    x = jax.random.normal(ks[8], (N, Cin, H, W), jnp.float32)

    fwd = jax.jit(inconv_forward)   # lets XLA fuse the NCHW<->NHWC plumbing around the kernel
    out = fwd(x, params)
    jax.block_until_ready(out)

    ref = ref_forward(x, params)
    assert out.shape == (N, Cout, H, W)
    max_err = float(jnp.max(jnp.abs(out - ref)))
    mean_err = float(jnp.mean(jnp.abs(out - ref)))
    # bf16 MXU operands (f32 accumulation) vs the f32 reference: ~1e-2-level tolerance.
    assert max_err < 5e-2 and mean_err < 1e-2, (
        f"Pallas kernel mismatch vs JAX reference: max={max_err} mean={mean_err}")

    print("KERNEL_OK")
</pallas_src>

<mosaic_0001>
module attributes {stable_mosaic.version = 11 : i64} {
  func.func @double_conv_kernel(%arg0: memref<2x16x64xf32, #tpu.memory_space<vmem>>, %arg1: memref<192x128xbf16, #tpu.memory_space<vmem>>, %arg2: memref<384x128xbf16, #tpu.memory_space<vmem>>, %arg3: memref<128x8xf32, #tpu.memory_space<vmem>>, %arg4: memref<8x128xf32, #tpu.memory_space<vmem>>, %arg5: memref<1x8xf32, #tpu.memory_space<vmem>>, %arg6: memref<1x8xf32, #tpu.memory_space<vmem>>, %arg7: memref<1x8xf32, #tpu.memory_space<vmem>>, %arg8: memref<1x8xf32, #tpu.memory_space<vmem>>, %arg9: memref<32x128xf32, #tpu.memory_space<vmem>>, %arg10: memref<2x16x192xf32, #tpu.memory_space<vmem>>, %arg11: memref<2x16x384xf32, #tpu.memory_space<vmem>>) attributes {dimension_semantics = [], scalar_prefetch = 0 : i64, scratch_operands = 2 : i64, tpu.core_type = #tpu.core_type<tc>} {
    %c0 = arith.constant 0 : index
    %c0_0 = arith.constant 0 : index
    %c0_1 = arith.constant 0 : index
    %0 = vector.load %arg0[%c0, %c0_0, %c0_1] : memref<2x16x64xf32, #tpu.memory_space<vmem>>, vector<2x16x64xf32>
    %cst = arith.constant 0.000000e+00 : f32
    %1 = vector.broadcast %cst : f32 to vector<2x1x64xf32>
    %c0_2 = arith.constant 0 : index
    %c0_3 = arith.constant 0 : index
    %c64 = arith.constant 64 : index
    %2 = vector.load %arg10[%c0_2, %c0_3, %c64] : memref<2x16x192xf32, #tpu.memory_space<vmem>>, vector<2x16x64xf32>
    tpu.vector_store %arg10[%c0_2, %c0_3, %c64], %0 {strides = array<i32>} : memref<2x16x192xf32, #tpu.memory_space<vmem>>, vector<2x16x64xf32>,
    %c0_4 = arith.constant 0 : index
    %c0_5 = arith.constant 0 : index
    %c0_6 = arith.constant 0 : index
    %3 = vector.load %arg10[%c0_4, %c0_5, %c0_6] : memref<2x16x192xf32, #tpu.memory_space<vmem>>, vector<2x1x64xf32>
    tpu.vector_store %arg10[%c0_4, %c0_5, %c0_6], %1 {strides = array<i32>} : memref<2x16x192xf32, #tpu.memory_space<vmem>>, vector<2x1x64xf32>,
    %4 = vector.extract_strided_slice %0 {offsets = [0, 0, 0], sizes = [2, 15, 64], strides = [1, 1, 1]} : vector<2x16x64xf32> to vector<2x15x64xf32>
    %c0_7 = arith.constant 0 : index
    %c1 = arith.constant 1 : index
    %c0_8 = arith.constant 0 : index
    %5 = vector.load %arg10[%c0_7, %c1, %c0_8] : memref<2x16x192xf32, #tpu.memory_space<vmem>>, vector<2x15x64xf32>
    tpu.vector_store %arg10[%c0_7, %c1, %c0_8], %4 {strides = array<i32>} : memref<2x16x192xf32, #tpu.memory_space<vmem>>, vector<2x15x64xf32>,
    %c0_9 = arith.constant 0 : index
    %c15 = arith.constant 15 : index
    %c128 = arith.constant 128 : index
    %6 = vector.load %arg10[%c0_9, %c15, %c128] : memref<2x16x192xf32, #tpu.memory_space<vmem>>, vector<2x1x64xf32>
    tpu.vector_store %arg10[%c0_9, %c15, %c128], %1 {strides = array<i32>} : memref<2x16x192xf32, #tpu.memory_space<vmem>>, vector<2x1x64xf32>,
    %7 = vector.extract_strided_slice %0 {offsets = [0, 1, 0], sizes = [2, 15, 64], strides = [1, 1, 1]} : vector<2x16x64xf32> to vector<2x15x64xf32>
    %c0_10 = arith.constant 0 : index
    %c0_11 = arith.constant 0 : index
    %c128_12 = arith.constant 128 : index
    %8 = vector.load %arg10[%c0_10, %c0_11, %c128_12] : memref<2x16x192xf32, #tpu.memory_space<vmem>>, vector<2x15x64xf32>
    tpu.vector_store %arg10[%c0_10, %c0_11, %c128_12], %7 {strides = array<i32>} : memref<2x16x192xf32, #tpu.memory_space<vmem>>, vector<2x15x64xf32>,
    %c0_13 = arith.constant 0 : index
    %c0_14 = arith.constant 0 : index
    %c0_15 = arith.constant 0 : index
    %9 = vector.load %arg10[%c0_13, %c0_14, %c0_15] : memref<2x16x192xf32, #tpu.memory_space<vmem>>, vector<2x16x192xf32>
    %10 = vector.shape_cast %9 : vector<2x16x192xf32> to vector<32x192xf32>
    %11 = arith.truncf %10 : vector<32x192xf32> to vector<32x192xbf16>
    %c0_16 = arith.constant 0 : index
    %c0_17 = arith.constant 0 : index
    %12 = vector.load %arg1[%c0_16, %c0_17] : memref<192x128xbf16, #tpu.memory_space<vmem>>, vector<192x128xbf16>
    %cst_18 = arith.constant dense<0.000000e+00> : vector<32x128xf32>
    %13 = tpu.matmul %11, %12, %cst_18 {dimension_numbers = #tpu.dot_dimension_numbers<[1], [0], [0], [1], [0, 0, 1, 1], [], []>} : vector<32x192xbf16>, vector<192x128xbf16>, vector<32x128xf32> -> vector<32x128xf32>
    %cst_19 = arith.constant dense<0.000000e+00> : vector<128xf32>
    %14 = vector.multi_reduction <add>, %13, %cst_19 [0] : vector<32x128xf32> to vector<128xf32>
    %15 = vector.shape_cast %14 : vector<128xf32> to vector<1x128xf32>
    %16 = arith.mulf %13, %13 : vector<32x128xf32>
    %cst_20 = arith.constant dense<0.000000e+00> : vector<128xf32>
    %17 = vector.multi_reduction <add>, %16, %cst_20 [0] : vector<32x128xf32> to vector<128xf32>
    %18 = vector.shape_cast %17 : vector<128xf32> to vector<1x128xf32>
    %19 = tpu.concatenate %15, %18 in 0 : vector<1x128xf32>, vector<1x128xf32> -> vector<2x128xf32>
    %c0_21 = arith.constant 0 : index
    %c0_22 = arith.constant 0 : index
    %20 = vector.load %arg3[%c0_21, %c0_22] : memref<128x8xf32, #tpu.memory_space<vmem>>, vector<128x8xf32>
    %cst_23 = arith.constant dense<0.000000e+00> : vector<2x8xf32>
    %21 = tpu.matmul %19, %20, %cst_23 {dimension_numbers = #tpu.dot_dimension_numbers<[1], [0], [0], [1], [0, 0, 1, 1], [], []>} : vector<2x128xf32>, vector<128x8xf32>, vector<2x8xf32> -> vector<2x8xf32>
    %22 = vector.extract_strided_slice %21 {offsets = [0, 0], sizes = [1, 8], strides = [1, 1]} : vector<2x8xf32> to vector<1x8xf32>
    %cst_24 = arith.constant 0.001953125 : f32
    %23 = vector.broadcast %cst_24 : f32 to vector<1x8xf32>
    %24 = arith.mulf %22, %23 : vector<1x8xf32>
    %25 = vector.extract_strided_slice %21 {offsets = [1, 0], sizes = [1, 8], strides = [1, 1]} : vector<2x8xf32> to vector<1x8xf32>
    %cst_25 = arith.constant 0.001953125 : f32
    %26 = vector.broadcast %cst_25 : f32 to vector<1x8xf32>
    %27 = arith.mulf %25, %26 : vector<1x8xf32>
    %28 = arith.mulf %24, %24 : vector<1x8xf32>
    %29 = arith.subf %27, %28 : vector<1x8xf32>
    %cst_26 = arith.constant 0.000000e+00 : f32
    %30 = vector.broadcast %cst_26 : f32 to vector<1x8xf32>
    %31 = arith.maximumf %29, %30 : vector<1x8xf32>
    %c0_27 = arith.constant 0 : index
    %c0_28 = arith.constant 0 : index
    %32 = vector.load %arg5[%c0_27, %c0_28] : memref<1x8xf32, #tpu.memory_space<vmem>>, vector<1x8xf32>
    %cst_29 = arith.constant 9.99999974E-6 : f32
    %33 = vector.broadcast %cst_29 : f32 to vector<1x8xf32>
    %34 = arith.addf %31, %33 : vector<1x8xf32>
    %35 = math.rsqrt %34 : vector<1x8xf32>
    %36 = arith.mulf %32, %35 : vector<1x8xf32>
    %c0_30 = arith.constant 0 : index
    %c0_31 = arith.constant 0 : index
    %37 = vector.load %arg6[%c0_30, %c0_31] : memref<1x8xf32, #tpu.memory_space<vmem>>, vector<1x8xf32>
    %38 = arith.mulf %24, %36 : vector<1x8xf32>
    %39 = arith.subf %37, %38 : vector<1x8xf32>
    %40 = tpu.concatenate %36, %39 in 0 : vector<1x8xf32>, vector<1x8xf32> -> vector<2x8xf32>
    %c0_32 = arith.constant 0 : index
    %c0_33 = arith.constant 0 : index
    %41 = vector.load %arg4[%c0_32, %c0_33] : memref<8x128xf32, #tpu.memory_space<vmem>>, vector<8x128xf32>
    %cst_34 = arith.constant dense<0.000000e+00> : vector<2x128xf32>
    %42 = tpu.matmul %40, %41, %cst_34 {dimension_numbers = #tpu.dot_dimension_numbers<[1], [0], [0], [1], [0, 0, 1, 1], [], []>} : vector<2x8xf32>, vector<8x128xf32>, vector<2x128xf32> -> vector<2x128xf32>
    %43 = vector.extract_strided_slice %42 {offsets = [0, 0], sizes = [1, 128], strides = [1, 1]} : vector<2x128xf32> to vector<1x128xf32>
    %44 = vector.broadcast %43 : vector<1x128xf32> to vector<32x128xf32>
    %45 = arith.mulf %13, %44 : vector<32x128xf32>
    %46 = vector.extract_strided_slice %42 {offsets = [1, 0], sizes = [1, 128], strides = [1, 1]} : vector<2x128xf32> to vector<1x128xf32>
    %47 = vector.broadcast %46 : vector<1x128xf32> to vector<32x128xf32>
    %48 = arith.addf %45, %47 : vector<32x128xf32>
    %cst_35 = arith.constant 0.000000e+00 : f32
    %49 = vector.broadcast %cst_35 : f32 to vector<32x128xf32>
    %50 = arith.maximumf %48, %49 : vector<32x128xf32>
    %51 = vector.shape_cast %50 : vector<32x128xf32> to vector<2x16x128xf32>
    %cst_36 = arith.constant 0.000000e+00 : f32
    %52 = vector.broadcast %cst_36 : f32 to vector<2x1x128xf32>
    %c0_37 = arith.constant 0 : index
    %c0_38 = arith.constant 0 : index
    %c128_39 = arith.constant 128 : index
    %53 = vector.load %arg11[%c0_37, %c0_38, %c128_39] : memref<2x16x384xf32, #tpu.memory_space<vmem>>, vector<2x16x128xf32>
    tpu.vector_store %arg11[%c0_37, %c0_38, %c128_39], %51 {strides = array<i32>} : memref<2x16x384xf32, #tpu.memory_space<vmem>>, vector<2x16x128xf32>,
    %c0_40 = arith.constant 0 : index
    %c0_41 = arith.constant 0 : index
    %c0_42 = arith.constant 0 : index
    %54 = vector.load %arg11[%c0_40, %c0_41, %c0_42] : memref<2x16x384xf32, #tpu.memory_space<vmem>>, vector<2x1x128xf32>
    tpu.vector_store %arg11[%c0_40, %c0_41, %c0_42], %52 {strides = array<i32>} : memref<2x16x384xf32, #tpu.memory_space<vmem>>, vector<2x1x128xf32>,
    %55 = vector.extract_strided_slice %51 {offsets = [0, 0, 0], sizes = [2, 15, 128], strides = [1, 1, 1]} : vector<2x16x128xf32> to vector<2x15x128xf32>
    %c0_43 = arith.constant 0 : index
    %c1_44 = arith.constant 1 : index
    %c0_45 = arith.constant 0 : index
    %56 = vector.load %arg11[%c0_43, %c1_44, %c0_45] : memref<2x16x384xf32, #tpu.memory_space<vmem>>, vector<2x15x128xf32>
    tpu.vector_store %arg11[%c0_43, %c1_44, %c0_45], %55 {strides = array<i32>} : memref<2x16x384xf32, #tpu.memory_space<vmem>>, vector<2x15x128xf32>,
    %c0_46 = arith.constant 0 : index
    %c15_47 = arith.constant 15 : index
    %c256 = arith.constant 256 : index
    %57 = vector.load %arg11[%c0_46, %c15_47, %c256] : memref<2x16x384xf32, #tpu.memory_space<vmem>>, vector<2x1x128xf32>
    tpu.vector_store %arg11[%c0_46, %c15_47, %c256], %52 {strides = array<i32>} : memref<2x16x384xf32, #tpu.memory_space<vmem>>, vector<2x1x128xf32>,
    %58 = vector.extract_strided_slice %51 {offsets = [0, 1, 0], sizes = [2, 15, 128], strides = [1, 1, 1]} : vector<2x16x128xf32> to vector<2x15x128xf32>
    %c0_48 = arith.constant 0 : index
    %c0_49 = arith.constant 0 : index
    %c256_50 = arith.constant 256 : index
    %59 = vector.load %arg11[%c0_48, %c0_49, %c256_50] : memref<2x16x384xf32, #tpu.memory_space<vmem>>, vector<2x15x128xf32>
    tpu.vector_store %arg11[%c0_48, %c0_49, %c256_50], %58 {strides = array<i32>} : memref<2x16x384xf32, #tpu.memory_space<vmem>>, vector<2x15x128xf32>,
    %c0_51 = arith.constant 0 : index
    %c0_52 = arith.constant 0 : index
    %c0_53 = arith.constant 0 : index
    %60 = vector.load %arg11[%c0_51, %c0_52, %c0_53] : memref<2x16x384xf32, #tpu.memory_space<vmem>>, vector<2x16x384xf32>
    %61 = vector.shape_cast %60 : vector<2x16x384xf32> to vector<32x384xf32>
    %62 = arith.truncf %61 : vector<32x384xf32> to vector<32x384xbf16>
    %c0_54 = arith.constant 0 : index
    %c0_55 = arith.constant 0 : index
    %63 = vector.load %arg2[%c0_54, %c0_55] : memref<384x128xbf16, #tpu.memory_space<vmem>>, vector<384x128xbf16>
    %cst_56 = arith.constant dense<0.000000e+00> : vector<32x128xf32>
    %64 = tpu.matmul %62, %63, %cst_56 {dimension_numbers = #tpu.dot_dimension_numbers<[1], [0], [0], [1], [0, 0, 1, 1], [], []>} : vector<32x384xbf16>, vector<384x128xbf16>, vector<32x128xf32> -> vector<32x128xf32>
    %cst_57 = arith.constant dense<0.000000e+00> : vector<128xf32>
    %65 = vector.multi_reduction <add>, %64, %cst_57 [0] : vector<32x128xf32> to vector<128xf32>
    %66 = vector.shape_cast %65 : vector<128xf32> to vector<1x128xf32>
    %67 = arith.mulf %64, %64 : vector<32x128xf32>
    %cst_58 = arith.constant dense<0.000000e+00> : vector<128xf32>
    %68 = vector.multi_reduction <add>, %67, %cst_58 [0] : vector<32x128xf32> to vector<128xf32>
    %69 = vector.shape_cast %68 : vector<128xf32> to vector<1x128xf32>
    %70 = tpu.concatenate %66, %69 in 0 : vector<1x128xf32>, vector<1x128xf32> -> vector<2x128xf32>
    %c0_59 = arith.constant 0 : index
    %c0_60 = arith.constant 0 : index
    %71 = vector.load %arg3[%c0_59, %c0_60] : memref<128x8xf32, #tpu.memory_space<vmem>>, vector<128x8xf32>
    %cst_61 = arith.constant dense<0.000000e+00> : vector<2x8xf32>
    %72 = tpu.matmul %70, %71, %cst_61 {dimension_numbers = #tpu.dot_dimension_numbers<[1], [0], [0], [1], [0, 0, 1, 1], [], []>} : vector<2x128xf32>, vector<128x8xf32>, vector<2x8xf32> -> vector<2x8xf32>
    %73 = vector.extract_strided_slice %72 {offsets = [0, 0], sizes = [1, 8], strides = [1, 1]} : vector<2x8xf32> to vector<1x8xf32>
    %cst_62 = arith.constant 0.001953125 : f32
    %74 = vector.broadcast %cst_62 : f32 to vector<1x8xf32>
    %75 = arith.mulf %73, %74 : vector<1x8xf32>
    %76 = vector.extract_strided_slice %72 {offsets = [1, 0], sizes = [1, 8], strides = [1, 1]} : vector<2x8xf32> to vector<1x8xf32>
    %cst_63 = arith.constant 0.001953125 : f32
    %77 = vector.broadcast %cst_63 : f32 to vector<1x8xf32>
    %78 = arith.mulf %76, %77 : vector<1x8xf32>
    %79 = arith.mulf %75, %75 : vector<1x8xf32>
    %80 = arith.subf %78, %79 : vector<1x8xf32>
    %cst_64 = arith.constant 0.000000e+00 : f32
    %81 = vector.broadcast %cst_64 : f32 to vector<1x8xf32>
    %82 = arith.maximumf %80, %81 : vector<1x8xf32>
    %c0_65 = arith.constant 0 : index
    %c0_66 = arith.constant 0 : index
    %83 = vector.load %arg7[%c0_65, %c0_66] : memref<1x8xf32, #tpu.memory_space<vmem>>, vector<1x8xf32>
    %cst_67 = arith.constant 9.99999974E-6 : f32
    %84 = vector.broadcast %cst_67 : f32 to vector<1x8xf32>
    %85 = arith.addf %82, %84 : vector<1x8xf32>
    %86 = math.rsqrt %85 : vector<1x8xf32>
    %87 = arith.mulf %83, %86 : vector<1x8xf32>
    %c0_68 = arith.constant 0 : index
    %c0_69 = arith.constant 0 : index
    %88 = vector.load %arg8[%c0_68, %c0_69] : memref<1x8xf32, #tpu.memory_space<vmem>>, vector<1x8xf32>
    %89 = arith.mulf %75, %87 : vector<1x8xf32>
    %90 = arith.subf %88, %89 : vector<1x8xf32>
    %91 = tpu.concatenate %87, %90 in 0 : vector<1x8xf32>, vector<1x8xf32> -> vector<2x8xf32>
    %c0_70 = arith.constant 0 : index
    %c0_71 = arith.constant 0 : index
    %92 = vector.load %arg4[%c0_70, %c0_71] : memref<8x128xf32, #tpu.memory_space<vmem>>, vector<8x128xf32>
    %cst_72 = arith.constant dense<0.000000e+00> : vector<2x128xf32>
    %93 = tpu.matmul %91, %92, %cst_72 {dimension_numbers = #tpu.dot_dimension_numbers<[1], [0], [0], [1], [0, 0, 1, 1], [], []>} : vector<2x8xf32>, vector<8x128xf32>, vector<2x128xf32> -> vector<2x128xf32>
    %94 = vector.extract_strided_slice %93 {offsets = [0, 0], sizes = [1, 128], strides = [1, 1]} : vector<2x128xf32> to vector<1x128xf32>
    %95 = vector.broadcast %94 : vector<1x128xf32> to vector<32x128xf32>
    %96 = arith.mulf %64, %95 : vector<32x128xf32>
    %97 = vector.extract_strided_slice %93 {offsets = [1, 0], sizes = [1, 128], strides = [1, 1]} : vector<2x128xf32> to vector<1x128xf32>
    %98 = vector.broadcast %97 : vector<1x128xf32> to vector<32x128xf32>
    %99 = arith.addf %96, %98 : vector<32x128xf32>
    %cst_73 = arith.constant 0.000000e+00 : f32
    %100 = vector.broadcast %cst_73 : f32 to vector<32x128xf32>
    %101 = arith.maximumf %99, %100 : vector<32x128xf32>
    %c0_74 = arith.constant 0 : index
    %c0_75 = arith.constant 0 : index
    %102 = vector.load %arg9[%c0_74, %c0_75] : memref<32x128xf32, #tpu.memory_space<vmem>>, vector<32x128xf32>
    tpu.vector_store %arg9[%c0_74, %c0_75], %101 {strides = array<i32>} : memref<32x128xf32, #tpu.memory_space<vmem>>, vector<32x128xf32>,
    return
  }
}

</mosaic_0001>

<bundles_post_ra>
// kernel: inconv_forward.1
= control target key start
LH: loop header
LB: loop body
LE: loop exit
PB: predicated region body
PF: predicated region fallthrough
CT: control target
= control target key end

     0   :  { %vm80_vm0 = vcmask 1046528   ;;  %vm92_vm1 = vcmask 522240   ;;  %v1408_v3 = vmov 0   ;;  %vm58_vm2 = vcmask 516096   ;;  %s1409_s15 = smov 64   ;;  %s1836_s0 = inlined_call_operand.vmem [shape: f32[2,16,64], index: 0, kind: input, shape index: {}]   ;;  %s1837_s1 = inlined_call_operand.vmem [shape: bf16[192,128], index: 1, kind: input, shape index: {}]   ;;  %s1838_s3 = inlined_call_operand.vmem [shape: f32[128,8], index: 3, kind: input, shape index: {}]   ;;  %s1839_s4 = inlined_call_operand.vmem [shape: f32[8,128], index: 4, kind: input, shape index: {}]   ;;  %s1840_s2 = inlined_call_operand.vmem [shape: bf16[384,128], index: 2, kind: input, shape index: {}]   ;;  %s1841_s5 = inlined_call_operand.vmem [shape: f32[1,8], index: 5, kind: input, shape index: {}]   ;;  %s1842_s6 = inlined_call_operand.vmem [shape: f32[1,8], index: 6, kind: input, shape index: {}]   ;;  %s1843_s7 = inlined_call_operand.vmem [shape: f32[1,8], index: 7, kind: input, shape index: {}]   ;;  %s1844_s8 = inlined_call_operand.vmem [shape: f32[1,8], index: 8, kind: input, shape index: {}]   ;;  %s1845_s9 = inlined_call_operand.vmem [shape: f32[32,128], index: 9, kind: output, shape index: {}]  }
   0x1   :  { %v1467_v0 = vld [vmem:[%s1836_s0] sm:$0xff]  ;;  %v34_v1 = vld [vmem:[%s1836_s0 + $0x8] sm:$0xff]  ;;  %v1475_v2 = vld [vmem:[%s1836_s0 + $0x10] sm:$0xff]  ;;  %210 = vmatprep.subr.bf16.mxu0 %v1408_v3  ;;  %v1410_v10 = vmov 0.0   ;;  %vm61_vm3 = vcmask 1040384   ;;  %vm74_vm4 = vcmask 523264  }
   0x2   :  { %41 = vrot.lane.b32.xlu0 %v1467_v0, %s1409_s15  ;;  %v62_v4 = vrot.slane %v1467_v0, 7  ;;  %v81_v5 = vrot.slane %v1467_v0, 1  ;;  %v63_v6 = vrot.slane %v34_v1, 7  ;;  %v82_v7 = vrot.slane %v34_v1, 1  ;;  %45 = vrot.lane.b32.xlu1 %v1475_v2, %s1409_s15  ;;  %v36_v8 = vld [vmem:[%s1836_s0 + $0x18] sm:$0xff]  ;;  %v1368_v9 = vld [vmem:[%s1837_s1] sm:$0xff]  }
   0x3   :  { %78 = vst.msk [vmem:[#allocation2 + $0x1f] sm:$0x1] %vm58_vm2, %v1410_v10  ;;  %79 = vst.msk [vmem:[#allocation2 + $0x3f] sm:$0x1] %vm58_vm2, %v1410_v10  ;;  %v65_v11 = vrot.slane %v1475_v2, 7  ;;  %v84_v12 = vrot.slane %v1475_v2, 1  ;;  %211 = vmatpush1.bf16.msra.mxu0 %v1368_v9 }
   0x4   :  { %505 = vst [vmem:[#allocation3] sm:$0x1] %v1410_v10  ;;  %506 = vst [vmem:[#allocation3 + $0x30] sm:$0x1] %v1410_v10  ;;  %v66_v13 = vrot.slane %v36_v8, 7  ;;  %v85_v14 = vrot.slane %v36_v8, 1  ;;  %v83_v15 = vsel %vm80_vm0, %v81_v5, %v82_v7  ;;  %212 = vmatprep.subr.bf16.mxu0 %v1408_v3  ;;  %v64_v18 = vsel %vm61_vm3, %v62_v4, %v63_v6 }
   0x5   :  { %525 = vst [vmem:[#allocation3 + $0x2f] sm:$0x1] %v1410_v10  ;;  %526 = vst [vmem:[#allocation3 + $0x5f] sm:$0x1] %v1410_v10  ;;  %v1369_v17 = vld [vmem:[%s1837_s1 + $0x8] sm:$0xff]   ;;  %v1370_v20 = vld [vmem:[%s1837_s1 + $0x10] sm:$0xff]  }
   0x6   :  { %93 = vst.msk [vmem:[#allocation2 + $0x18] sm:$0x7f] %vm92_vm1, %v82_v7  ;;  %95 = vst.msk [vmem:[#allocation2 + $0x38] sm:$0x7f] %vm92_vm1, %v85_v14  ;;  %v86_v16 = vsel %vm80_vm0, %v84_v12, %v85_v14  ;;  %43 = vrot.lane.b32.xlu0 %v34_v1, %s1409_s15  ;;  %47 = vrot.lane.b32.xlu1 %v36_v8, %s1409_s15  ;;  %v67_v19 = vsel %vm61_vm3, %v65_v11, %v66_v13  ;;  %v1371_v21 = vld [vmem:[%s1837_s1 + $0x18] sm:$0xff]   ;;  %v1411_v22 = vmov 0.0|0.0  }
   0x7   :  { %94 = vst.msk [vmem:[#allocation2 + $0x28] sm:$0xff] %vm74_vm4, %v86_v16  ;;  %91 = vst.msk [vmem:[#allocation2 + $0x8] sm:$0xff] %vm74_vm4, %v83_v15  ;;  %213 = vmatpush1.bf16.msra.mxu0 %v1369_v17  ;;  %1314 = vmatprep.subr.bf16.mxu1 %v1411_v22  ;;  %v1372_v24 = vld [vmem:[%s1837_s1 + $0x20] sm:$0xff]   ;;  %v283_v28 = vld [vmem:[%s1838_s3 + $0x8] sm:$0xff]  ;;  %vm53_vm5 = vcmask 1048064   ;;  %vm72_vm6 = vcmask 523265  }
   0x8   :  { %214 = vmatprep.subr.bf16.mxu0 %v1408_v3  ;;  %v282_v27 = vld [vmem:[%s1838_s3] sm:$0xff]  ;;  %v1373_v30 = vld [vmem:[%s1837_s1 + $0x28] sm:$0xff]   ;;  %v1374_v31 = vld [vmem:[%s1837_s1 + $0x30] sm:$0xff]   ;;  %vm1412_vm7 = vmmov 0   ;;  %vm407_vm8 = vcmask 64512  }
   0x9   :  { %v1533_v29 = vpack.c.bf16 %v283_v28, %v282_v27  ;;  %v1375_v32 = vld [vmem:[%s1837_s1 + $0x38] sm:$0xff]   ;;  %v1376_v33 = vld [vmem:[%s1837_s1 + $0x40] sm:$0xff]   ;;  %v1377_v34 = vld [vmem:[%s1837_s1 + $0x48] sm:$0xff]   ;;  %1246 = vmatprep.mubr.msk.f32.mxu1 %vm1412_vm7, %v1410_v10 }
   0xa   :  { %v1378_v35 = vld [vmem:[%s1837_s1 + $0x50] sm:$0xff]   ;;  %v1379_v36 = vld [vmem:[%s1837_s1 + $0x58] sm:$0xff]   ;;  %v286_v53 = vld [vmem:[%s1838_s3 + $0x20] sm:$0xff] }
   0xb   :  { %215 = vmatpush1.bf16.msra.mxu0 %v1370_v20  ;;  %1316 = vmatpush3.bf16.msra.mxu1 %v1533_v29  ;;  %v284_v50 = vld [vmem:[%s1838_s3 + $0x10] sm:$0xff]  ;;  %v285_v51 = vld [vmem:[%s1838_s3 + $0x18] sm:$0xff]  ;;  %v287_v54 = vld [vmem:[%s1838_s3 + $0x28] sm:$0xff] }
   0xc   :  { %216 = vmatprep.subr.bf16.mxu0 %v1408_v3  ;;  %1317 = vmatprep.subr.bf16.mxu1 %v1411_v22  ;;  %v1583_v52 = vpack.c.bf16 %v285_v51, %v284_v50  ;;  %v1593_v55 = vpack.c.bf16 %v287_v54, %v286_v53  ;;  %v288_v56 = vld [vmem:[%s1838_s3 + $0x30] sm:$0xff]  ;;  %v289_v57 = vld [vmem:[%s1838_s3 + $0x38] sm:$0xff]  ;;  %v290_v59 = vld [vmem:[%s1838_s3 + $0x40] sm:$0xff] }
   0xd   :  { %v99_v25 = vld [vmem:[#allocation2 + $0x18] sm:$0xff]  ;;  %v1603_v58 = vpack.c.bf16 %v289_v57, %v288_v56  ;;  %v291_v60 = vld [vmem:[%s1838_s3 + $0x48] sm:$0xff]  ;;  %v292_v62 = vld [vmem:[%s1838_s3 + $0x50] sm:$0xff]  ;;  %v1413_v56 = vmov 1966171168  }
   0xe   :  { %v97_v23 = vld [vmem:[#allocation2 + $0x8] sm:$0xff]  ;;  %v103_v42 = vld [vmem:[#allocation2 + $0x38] sm:$0xff]  ;;  %v1613_v61 = vpack.c.bf16 %v291_v60, %v290_v59  ;;  %v294_v1 = vld [vmem:[%s1838_s3 + $0x60] sm:$0xff]  ;;  %v380_v57 = vunpack.c.l.s4 %v1413_v56  ;;  %v382_v59 = vlaneseq }
   0xf   :  { %217 = vmatpush1.bf16.msra.mxu0 %v1371_v21  ;;  %v105_v26 = vpack.c.bf16 %v99_v25, %v97_v23  ;;  %v101_v41 = vld [vmem:[#allocation2 + $0x28] sm:$0xff]  ;;  %1319 = vmatpush3.bf16.msra.mxu1 %v1583_v52  ;;  %v293_v63 = vld [vmem:[%s1838_s3 + $0x58] sm:$0xff] }
  0x10   :  { %218 = vmatprep.subr.bf16.mxu0 %v1408_v3  ;;  %v107_v45 = vpack.c.bf16 %v103_v42, %v101_v41  ;;  %1320 = vmatprep.subr.bf16.mxu1 %v1411_v22  ;;  %v1623_v0 = vpack.c.bf16 %v293_v63, %v292_v62  ;;  %v295_v2 = vld [vmem:[%s1838_s3 + $0x68] sm:$0xff]  ;;  %v297_v5 = vld [vmem:[%s1838_s3 + $0x78] sm:$0xff]  ;;  %v1675_v41 = vld [vmem:[%s1839_s4] sm:$0xff]  ;;  %v381_v60 = vunpack.c.0.s8 %v380_v57  ;;  %v1690_v62 = vshrl.u32 %v382_v59, 7 }
  0x11   :  { %1110 = vmatprep.mubr.msk.bf16.mxu0 %vm74_vm4, %v105_v26  ;;  %v1380_v42 = vld [vmem:[%s1840_s2 + $0x40] sm:$0xff]  }
  0x12   :  { %v1693_v63 = vsub.s32 %v381_v60, %v1690_v62 }
  0x13   :  { %219 = vmatpush1.bf16.msra.mxu0 %v1372_v24  ;;  %1322 = vmatpush3.bf16.msra.mxu1 %v1593_v55 }
  0x14   :  { %220 = vmatprep.subr.bf16.mxu0 %v1408_v3  ;;  %1323 = vmatprep.subr.bf16.mxu1 %v1411_v22 }
  0x17   :  { %221 = vmatpush1.bf16.msra.mxu0 %v1373_v30  ;;  %1325 = vmatpush3.bf16.msra.mxu1 %v1603_v58 }
  0x18   :  { %222 = vmatprep.subr.bf16.mxu0 %v1408_v3  ;;  %1326 = vmatprep.subr.bf16.mxu1 %v1411_v22 }
  0x1b   :  { %223 = vmatpush1.bf16.msra.mxu0 %v1374_v31  ;;  %1328 = vmatpush3.bf16.msra.mxu1 %v1613_v61 }
  0x1c   :  { %224 = vmatprep.subr.bf16.mxu0 %v1408_v3  ;;  %1329 = vmatprep.subr.bf16.mxu1 %v1411_v22 }
  0x1f   :  { %225 = vmatpush1.bf16.msra.mxu0 %v1375_v32  ;;  %1331 = vmatpush3.bf16.msra.mxu1 %v1623_v0 }
  0x20   :  { %226 = vmatprep.subr.bf16.mxu0 %v1408_v3  ;;  %1332 = vmatprep.subr.bf16.mxu1 %v1411_v22 }
  0x23   :  { %227 = vmatpush1.bf16.msra.mxu0 %v1376_v33 }
  0x24   :  { %228 = vmatprep.subr.bf16.mxu0 %v1408_v3 }
  0x27   :  { %229 = vmatpush1.bf16.msra.mxu0 %v1377_v34 }
  0x28   :  { %230 = vmatprep.subr.bf16.mxu0 %v1408_v3 }
  0x2b   :  { %231 = vmatpush1.bf16.msra.mxu0 %v1378_v35 }
  0x2c   :  { %232 = vmatprep.subr.bf16.mxu0 %v1408_v3  ;;  %v1633_v3 = vpack.c.bf16 %v295_v2, %v294_v1 }
  0x2e   :  { %1334 = vmatpush3.bf16.msra.mxu1 %v1633_v3 }
  0x2f   :  { %233 = vmatpush1.bf16.msra.mxu0 %v1379_v36  ;;  %1335 = vmatprep.subr.bf16.mxu1 %v1411_v22 }
  0x74   :  { %v42_v37 = vpop.permute.xlu0 %41  ;;  %v46_v38 = vpop.permute.xlu1 %45 }
  0x75   :  { %54 = vst.msk [vmem:[#allocation2] sm:$0xff] %vm53_vm5, %v42_v37  ;;  %56 = vst.msk [vmem:[#allocation2 + $0x20] sm:$0xff] %vm53_vm5, %v46_v38 }
  0x76   :  { %59 = vst.msk [vmem:[#allocation2] sm:$0x1] %vm58_vm2, %v1410_v10  ;;  %60 = vst.msk [vmem:[#allocation2 + $0x20] sm:$0x1] %vm58_vm2, %v1410_v10 }
  0x77   :  { %73 = vst.msk [vmem:[#allocation2] sm:$0xfe] %vm72_vm6, %v62_v4  ;;  %76 = vst.msk [vmem:[#allocation2 + $0x20] sm:$0xfe] %vm72_vm6, %v65_v11  ;;  %v296_v4 = vld [vmem:[%s1838_s3 + $0x70] sm:$0xff] }
  0x78   :  { %v44_v39 = vpop.permute.xlu0 %43  ;;  %v48_v40 = vpop.permute.xlu1 %47  ;;  %v1644_v6 = vpack.c.bf16 %v297_v5, %v296_v4  ;;  %v375_v5 = vld [vmem:[%s1841_s5] sm:$0x1] }
  0x79   :  { %55 = vst.msk [vmem:[#allocation2 + $0x10] sm:$0xff] %vm53_vm5, %v44_v39  ;;  %57 = vst.msk [vmem:[#allocation2 + $0x30] sm:$0xff] %vm53_vm5, %v48_v40 }
  0x7a   :  { %75 = vst.msk [vmem:[#allocation2 + $0x10] sm:$0xff] %vm74_vm4, %v64_v18  ;;  %77 = vst.msk [vmem:[#allocation2 + $0x30] sm:$0xff] %vm74_vm4, %v67_v19  ;;  %1337 = vmatpush3.bf16.msra.mxu1 %v1644_v6 }
  0x7b   :  { %1249 = vmatprep.subr.mxu1 %v1410_v10 }
  0x7e   :  { %v96_v43 = vld [vmem:[#allocation2] sm:$0xff] }
  0x7f   :  { %v100_v47 = vld [vmem:[#allocation2 + $0x20] sm:$0xff] }
  0x81   :  { %v98_v44 = vld [vmem:[#allocation2 + $0x10] sm:$0xff] }
  0x82   :  { %v104_v46 = vpack.c.bf16 %v98_v44, %v96_v43  ;;  %v102_v48 = vld [vmem:[#allocation2 + $0x30] sm:$0xff]  ;;  %v1382_v43 = vld [vmem:[%s1840_s2 + $0x80] sm:$0xff]   ;;  %v1385_v44 = vld [vmem:[%s1840_s2 + $0x88] sm:$0xff]  }
  0x83   :  { %v106_v49 = vpack.c.bf16 %v102_v48, %v100_v47  ;;  %1254 = vmatprep.subr.bf16.mxu0 %v1382_v43 }
  0x84   :  { %243 = vmatmul.mubr.bf16.vlgmr.msra.gmra.mrb[0].mxu0 %v104_v46 }
  0x85   :  { %1111 = vmatprep.mubr.msk.bf16.mxu0 %vm74_vm4, %v107_v45  ;;  %1255 = vmatpush3.bf16.msra.mxu0 %v1382_v43  ;;  %v1388_v45 = vld [vmem:[%s1840_s2 + $0x90] sm:$0xff]   ;;  %v491_v43 = vsub.s32 1, %v1690_v62 }
  0x86   :  { %1256 = vmatprep.subr.bf16.mxu0 %v1385_v44 }
  0x89   :  { %1257 = vmatpush3.bf16.msra.mxu0 %v1385_v44 }
  0x8a   :  { %1258 = vmatprep.subr.bf16.mxu0 %v1388_v45 }
  0x8c   :  { %251 = vmatmul.mubr.bf16.gmra.mrb[4].mxu0 %v106_v49 }
  0x8d   :  { %1259 = vmatpush3.bf16.msra.mxu0 %v1388_v45 }
 0x157   :  { %v1649_v7 = vpop.f32.mrb[0].mxu0 }
 0x158   :  { %v246_v8 = vpop.f32.mrb[1].mxu0  ;;  %v268_v11 = vmul.f32 %v1649_v7, %v1649_v7 }
 0x159   :  { %v1651_v9 = vpop.f32.mrb[2].mxu0 }
 0x15a   :  { %v259_v12 = vadd.f32 %v1651_v9, %v1649_v7  ;;  %v269_v13 = vmul.f32 %v1651_v9, %v1651_v9  ;;  %v249_v14 = vpop.f32.mrb[3].mxu0 }
 0x15b   :  { %v1704_v14 = vsub.s32 0, %v1690_v62 }
 0x15c   :  { %v272_v15 = vadd.f32 %v269_v13, %v268_v11 }
 0x15f   :  { %v1659_v16 = vpop.f32.mrb[4].mxu0 }
 0x160   :  { %v260_v17 = vadd.f32 %v259_v12, %v1659_v16  ;;  %v270_v18 = vmul.f32 %v1659_v16, %v1659_v16  ;;  %v254_v19 = vpop.f32.mrb[5].mxu0  ;;  %v396_v12 = vld [vmem:[%s1842_s6] sm:$0x1] }
 0x161   :  { %v1664_v20 = vpop.f32.mrb[6].mxu0  ;;  %v1383_v19 = vld [vmem:[%s1840_s2 + $0x48] sm:$0xff]  }
 0x162   :  { %v273_v21 = vadd.f32 %v272_v15, %v270_v18  ;;  %v261_v23 = vadd.f32 %v260_v17, %v1664_v20  ;;  %v271_v24 = vmul.f32 %v1664_v20, %v1664_v20  ;;  %v257_v25 = vpop.f32.mrb[7].mxu0  ;;  %v1381_v18 = vld [vmem:[%s1840_s2] sm:$0xff]  }
 0x163   :  { %v1387_v25 = vld [vmem:[%s1840_s2 + $0x10] sm:$0xff]  }
 0x164   :  { %v262_v26 = vrot.slane %v261_v23, 4  ;;  %v274_v27 = vadd.f32 %v273_v21, %v271_v24  ;;  %v1386_v24 = vld [vmem:[%s1840_s2 + $0x50] sm:$0xff]  }
 0x166   :  { %v263_v28 = vadd.f32 %v262_v26, %v261_v23  ;;  %v275_v30 = vrot.slane %v274_v27, 4  ;;  %v1384_v23 = vld [vmem:[%s1840_s2 + $0x8] sm:$0xff]   ;;  %v1389_v26 = vld [vmem:[%s1840_s2 + $0x58] sm:$0xff]  }
 0x168   :  { %v264_v31 = vrot.slane %v263_v28, 2  ;;  %v276_v32 = vadd.f32 %v275_v30, %v274_v27  ;;  %v1390_v27 = vld [vmem:[%s1840_s2 + $0x18] sm:$0xff]   ;;  %v1392_v30 = vld [vmem:[%s1840_s2 + $0x60] sm:$0xff]  }
 0x16a   :  { %v265_v33 = vadd.f32 %v264_v31, %v263_v28  ;;  %v277_v34 = vrot.slane %v276_v32, 2  ;;  %v1391_v28 = vld [vmem:[%s1840_s2 + $0x98] sm:$0xff]   ;;  %v1393_v31 = vld [vmem:[%s1840_s2 + $0x20] sm:$0xff]  }
 0x16b   :  { %1260 = vmatprep.subr.bf16.mxu0 %v1391_v28 }
 0x16c   :  { %v266_v35 = vrot.slane %v265_v33, 1  ;;  %v278_v36 = vadd.f32 %v277_v34, %v276_v32  ;;  %1261 = vmatpush3.bf16.msra.mxu0 %v1391_v28  ;;  %v1394_v32 = vld [vmem:[%s1840_s2 + $0xa0] sm:$0xff]   ;;  %v1396_v34 = vld [vmem:[%s1840_s2 + $0x28] sm:$0xff]  }
 0x16d   :  { %1262 = vmatprep.subr.bf16.mxu0 %v1394_v32 }
 0x16e   :  { %v279_v37 = vrot.slane %v278_v36, 1  ;;  %v267_v38 = vadd.f32 %v266_v35, %v265_v33  ;;  %v1395_v33 = vld [vmem:[%s1840_s2 + $0x68] sm:$0xff]  }
 0x16f   :  { %v1397_v35 = vld [vmem:[%s1840_s2 + $0xa8] sm:$0xff]  }
 0x170   :  { %v280_v39 = vadd.f32 %v279_v37, %v278_v36  ;;  %1263 = vmatpush3.bf16.msra.mxu0 %v1394_v32  ;;  %v1398_v36 = vld [vmem:[%s1840_s2 + $0x70] sm:$0xff]  }
 0x171   :  { %1264 = vmatprep.subr.bf16.mxu0 %v1397_v35  ;;  %v1399_v37 = vld [vmem:[%s1840_s2 + $0x30] sm:$0xff]  }
 0x172   :  { %v281_v40 = vsel %vm61_vm3, %v267_v38, %v280_v39  ;;  %v1400_v38 = vld [vmem:[%s1840_s2 + $0xb0] sm:$0xff]   ;;  %v1401_v39 = vld [vmem:[%s1840_s2 + $0x78] sm:$0xff]  }
 0x173   :  { %1247 = vmatmul.mubr.f32.vlgmr.msra.gmra.mrb[0].mxu1 %v281_v40  ;;  %v1403_v40 = vld [vmem:[%s1840_s2 + $0xb8] sm:$0xff]  }
 0x174   :  { %1251 = vmatprep.mubr.msk.f32.mxu1 %vm1412_vm7, %v1410_v10  ;;  %1250 = vmatpush3.msra.mxu1 %v1675_v41 }
 0x175   :  { %1157 = vmatprep.subr.bf16.mxu1 %v1380_v42  ;;  %1265 = vmatpush3.bf16.msra.mxu0 %v1397_v35  ;;  %v1402_v42 = vld [vmem:[%s1840_s2 + $0x38] sm:$0xff]  }
 0x176   :  { %1266 = vmatprep.subr.bf16.mxu0 %v1400_v38 }
 0x179   :  { %1267 = vmatpush3.bf16.msra.mxu0 %v1400_v38 }
 0x17a   :  { %1268 = vmatprep.subr.bf16.mxu0 %v1403_v40 }
 0x17d   :  { %1269 = vmatpush3.bf16.msra.mxu0 %v1403_v40 }
 0x17e   :  { %1309 = vmatprep.subr.mxu0 %v1410_v10 }
 0x246   :  { %v364_v46 = vpop.f32.mrb[0].mxu1 }
 0x247   :  { %v368_v47 = vmul.f32 0.001953125, %v364_v46  ;;  %v1248_v48 = vpop.f32.mrb[1].mxu1 }
 0x249   :  { %v369_v49 = vmul.f32 %v368_v47, %v368_v47 }
 0x24b   :  { %v371_v50 = vrot.slane %v369_v49, 7 }
 0x24d   :  { %v373_v51 = vsub.f32 %v368_v47, %v371_v50 }
 0x24f   :  { %v374_v53 = vmax.f32 %v373_v51, 0.0 }
 0x251   :  { %v376_v54 = vadd.f32 1e-05, %v374_v53 }
 0x253   :  { %1404 = vrsqrt.f32 %v376_v54 }
 0x25d   :  { %v1405_v1 = vpop.eup %1404 }
 0x25e   :  { %v385_v2 = vrot.slane %v1405_v1, %v1693_v63 }
 0x260   :  { %v386_v4 = vcombine.high %v385_v2, %v385_v2 }
 0x262   :  { %v393_v8 = vrot.slane %v386_v4, %v1693_v63 }
 0x264   :  { %v395_v11 = vmul.f32 %v393_v8, %v375_v5 }
 0x266   :  { %v397_v13 = vmul.f32 %v395_v11, %v368_v47 }
 0x268   :  { %v398_v15 = vsub.f32 %v396_v12, %v397_v13 }
 0x26a   :  { %v403_v17 = vrot.slane %v398_v15, %v1704_v14 }
 0x26c   :  { %v405_v21 = vsel %vm61_vm3, %v395_v11, %v403_v17 }
 0x26d   :  { %1252 = vmatmul.mubr.msk.f32.vlgmr.msra.gmra.mrb[2].mxu1 %vm407_vm8, %v405_v21 }
 0x26e   :  { %1158 = vmatpush3.bf16.msra.mxu1 %v1381_v18 }
 0x26f   :  { %1159 = vmatprep.subr.bf16.mxu1 %v1383_v19 }
 0x272   :  { %1160 = vmatpush3.bf16.msra.mxu1 %v1384_v23 }
 0x273   :  { %1161 = vmatprep.subr.bf16.mxu1 %v1386_v24 }
 0x276   :  { %1162 = vmatpush3.bf16.msra.mxu1 %v1387_v25 }
 0x277   :  { %1163 = vmatprep.subr.bf16.mxu1 %v1389_v26 }
 0x27a   :  { %1164 = vmatpush3.bf16.msra.mxu1 %v1390_v27 }
 0x27b   :  { %1165 = vmatprep.subr.bf16.mxu1 %v1392_v30 }
 0x27e   :  { %1166 = vmatpush3.bf16.msra.mxu1 %v1393_v31 }
 0x27f   :  { %1167 = vmatprep.subr.bf16.mxu1 %v1395_v33 }
 0x282   :  { %1168 = vmatpush3.bf16.msra.mxu1 %v1396_v34 }
 0x283   :  { %1169 = vmatprep.subr.bf16.mxu1 %v1398_v36 }
 0x286   :  { %1170 = vmatpush3.bf16.msra.mxu1 %v1399_v37 }
 0x287   :  { %1171 = vmatprep.subr.bf16.mxu1 %v1401_v39 }
 0x28a   :  { %1172 = vmatpush3.bf16.msra.mxu1 %v1402_v42 }
 0x28b   :  { %1338 = vmatprep.subr.bf16.mxu1 %v1411_v22 }
 0x340   :  { %v477_v44 = vpop.f32.mrb[2].mxu1 }
 0x341   :  { %v484_v45 = vrot.slane %v477_v44, %v1704_v14  ;;  %v1253_v46 = vpop.f32.mrb[3].mxu1  ;;  %v492_v47 = vrot.slane %v477_v44, %v491_v43 }
 0x343   :  { %v485_v48 = vmul.f32 %v484_v45, %v1649_v7  ;;  %v486_v49 = vmul.f32 %v484_v45, %v1651_v9  ;;  %v487_v50 = vmul.f32 %v484_v45, %v1659_v16  ;;  %v488_v51 = vmul.f32 %v484_v45, %v1664_v20 }
 0x345   :  { %v493_v53 = vadd.f32 %v492_v47, %v485_v48  ;;  %v494_v54 = vadd.f32 %v492_v47, %v486_v49  ;;  %v495_v56 = vadd.f32 %v492_v47, %v487_v50  ;;  %v496_v57 = vadd.f32 %v492_v47, %v488_v51 }
 0x347   :  { %v497_v59 = vmax.f32 %v493_v53, 0.0  ;;  %v498_v60 = vmax.f32 %v494_v54, 0.0  ;;  %v499_v1 = vmax.f32 %v495_v56, 0.0  ;;  %v500_v2 = vmax.f32 %v496_v57, 0.0 }
 0x349   :  { %v511_v4 = vrot.slane %v497_v59, 7  ;;  %v512_v5 = vrot.slane %v498_v60, 7  ;;  %v514_v8 = vrot.slane %v499_v1, 7  ;;  %v515_v11 = vrot.slane %v500_v2, 7 }
 0x34a   :  { %v527_v12 = vrot.slane %v497_v59, 1  ;;  %v528_v7 = vrot.slane %v498_v60, 1  ;;  %v530_v13 = vrot.slane %v499_v1, 1  ;;  %v531_v9 = vrot.slane %v500_v2, 1 }
 0x34b   :  { %v513_v16 = vsel %vm61_vm3, %v511_v4, %v512_v5  ;;  %v516_v20 = vsel %vm61_vm3, %v514_v8, %v515_v11  ;;  %521 = vst [vmem:[#allocation3] sm:$0xfe] %v511_v4  ;;  %523 = vst [vmem:[#allocation3 + $0x30] sm:$0xfe] %v514_v8  ;;  %v554_v15 = vpack.c.bf16 %v498_v60, %v497_v59 }
 0x34c   :  { %v557_v17 = vpack.c.bf16 %v500_v2, %v499_v1  ;;  %v529_v18 = vsel %vm80_vm0, %v527_v12, %v528_v7  ;;  %v532_v19 = vsel %vm80_vm0, %v530_v13, %v531_v9  ;;  %538 = vst [vmem:[#allocation3 + $0x28] sm:$0x7f] %v528_v7  ;;  %540 = vst [vmem:[#allocation3 + $0x58] sm:$0x7f] %v531_v9 }
 0x34d   :  { %783 = vmatprep.mubr.bf16.mxu1 %v554_v15 }
 0x352   :  { %v541_v21 = vld [vmem:[#allocation3] sm:$0xff]  ;;  %v547_v28 = vld [vmem:[#allocation3 + $0x30] sm:$0xff] }
 0x353   :  { %v553_v23 = vpack.c.bf16 %v513_v16, %v541_v21  ;;  %v546_v24 = vld [vmem:[#allocation3 + $0x28] sm:$0xff]  ;;  %v552_v25 = vld [vmem:[#allocation3 + $0x58] sm:$0xff]  ;;  %v556_v30 = vpack.c.bf16 %v516_v20, %v547_v28 }
 0x354   :  { %v555_v26 = vpack.c.bf16 %v546_v24, %v529_v18  ;;  %v558_v27 = vpack.c.bf16 %v552_v25, %v532_v19  ;;  %v965_v24 = vld [vmem:[%s1843_s7] sm:$0x1] }
 0x355   :  { %784 = vmatmul.mubr.bf16.vlgmr.msra.gmra.mrb[4].mxu1 %v553_v23 }
 0x356   :  { %1270 = vmatprep.mubr.bf16.mxu0 %v555_v26  ;;  %791 = vmatprep.mubr.bf16.mxu1 %v557_v17 }
 0x357   :  { %1271 = vmatmul.mubr.bf16.vlgmr.msra.gmra.mrb[8].mxu0 %v558_v27  ;;  %1340 = vmatpush3.bf16.msra.mxu1 %v1533_v29  ;;  %v986_v27 = vld [vmem:[%s1844_s8] sm:$0x1] }
 0x358   :  { %1341 = vmatprep.subr.bf16.mxu1 %v1411_v22  ;;  %1310 = vmatpush3.msra.mxu0 %v1675_v41 }
 0x359   :  { %1311 = vmatprep.mubr.msk.f32.mxu0 %vm1412_vm7, %v1410_v10 }
 0x35b   :  { %1343 = vmatpush3.bf16.msra.mxu1 %v1583_v52 }
 0x35c   :  { %1344 = vmatprep.subr.bf16.mxu1 %v1411_v22 }
 0x35d   :  { %792 = vmatmul.mubr.bf16.gmra.mrb[8].mxu1 %v556_v30 }
 0x35e   :  { %1306 = vmatprep.mubr.msk.f32.mxu1 %vm1412_vm7, %v1410_v10 }
 0x35f   :  { %1346 = vmatpush3.bf16.msra.mxu1 %v1593_v55 }
 0x360   :  { %1347 = vmatprep.subr.bf16.mxu1 %v1411_v22 }
 0x363   :  { %1349 = vmatpush3.bf16.msra.mxu1 %v1603_v58 }
 0x364   :  { %1350 = vmatprep.subr.bf16.mxu1 %v1411_v22 }
 0x367   :  { %1352 = vmatpush3.bf16.msra.mxu1 %v1613_v61 }
 0x368   :  { %1353 = vmatprep.subr.bf16.mxu1 %v1411_v22 }
 0x36b   :  { %1355 = vmatpush3.bf16.msra.mxu1 %v1623_v0 }
 0x36c   :  { %1356 = vmatprep.subr.bf16.mxu1 %v1411_v22 }
 0x36f   :  { %1358 = vmatpush3.bf16.msra.mxu1 %v1633_v3 }
 0x370   :  { %1359 = vmatprep.subr.bf16.mxu1 %v1411_v22 }
 0x373   :  { %1361 = vmatpush3.bf16.msra.mxu1 %v1644_v6 }
 0x428   :  { %v1173_v10 = vpop.f32.mrb[4].mxu1 }
 0x429   :  { %v1174_v29 = vpop.f32.mrb[5].mxu1 }
 0x42a   :  { %v1175_v52 = vadd.f32 %v1174_v29, %v1173_v10  ;;  %v1272_v55 = vpop.f32.mrb[8].mxu0  ;;  %v1176_v58 = vpop.f32.mrb[6].mxu1 }
 0x42b   :  { %v834_v41 = vpop.f32.mrb[9].mxu0  ;;  %v1177_v31 = vpop.f32.mrb[7].mxu1 }
 0x42c   :  { %v1803_v61 = vadd.f32 %v1175_v52, %v834_v41  ;;  %v1178_v32 = vadd.f32 %v1177_v31, %v1176_v58  ;;  %v1273_v33 = vpop.f32.mrb[10].mxu0 }
 0x42d   :  { %v837_v0 = vpop.f32.mrb[11].mxu0 }
 0x42e   :  { %v838_v34 = vadd.f32 %v1178_v32, %v837_v0  ;;  %v858_v6 = vmul.f32 %v1803_v61, %v1803_v61 }
 0x430   :  { %v1179_v35 = vpop.f32.mrb[8].mxu1  ;;  %v859_v3 = vmul.f32 %v838_v34, %v838_v34  ;;  %v849_v39 = vadd.f32 %v838_v34, %v1803_v61 }
 0x431   :  { %v1180_v36 = vpop.f32.mrb[9].mxu1 }
 0x432   :  { %v1181_v37 = vadd.f32 %v1180_v36, %v1179_v35  ;;  %v1182_v22 = vpop.f32.mrb[10].mxu1  ;;  %v862_v44 = vadd.f32 %v859_v3, %v858_v6 }
 0x433   :  { %v1183_v38 = vpop.f32.mrb[11].mxu1 }
 0x434   :  { %v843_v40 = vadd.f32 %v1272_v55, %v1181_v37  ;;  %v1184_v42 = vadd.f32 %v1183_v38, %v1182_v22 }
 0x436   :  { %v850_v45 = vadd.f32 %v849_v39, %v843_v40  ;;  %v860_v46 = vmul.f32 %v843_v40, %v843_v40  ;;  %v846_v47 = vadd.f32 %v1273_v33, %v1184_v42 }
 0x438   :  { %v863_v48 = vadd.f32 %v862_v44, %v860_v46  ;;  %v851_v49 = vadd.f32 %v850_v45, %v846_v47  ;;  %v861_v50 = vmul.f32 %v846_v47, %v846_v47 }
 0x43a   :  { %v852_v51 = vrot.slane %v851_v49, 4  ;;  %v864_v53 = vadd.f32 %v863_v48, %v861_v50 }
 0x43c   :  { %v853_v54 = vadd.f32 %v852_v51, %v851_v49  ;;  %v865_v56 = vrot.slane %v864_v53, 4 }
 0x43e   :  { %v854_v57 = vrot.slane %v853_v54, 2  ;;  %v866_v59 = vadd.f32 %v865_v56, %v864_v53 }
 0x440   :  { %v855_v60 = vadd.f32 %v854_v57, %v853_v54  ;;  %v867_v1 = vrot.slane %v866_v59, 2 }
 0x442   :  { %v856_v2 = vrot.slane %v855_v60, 1  ;;  %v868_v4 = vadd.f32 %v867_v1, %v866_v59 }
 0x444   :  { %v869_v5 = vrot.slane %v868_v4, 1  ;;  %v857_v8 = vadd.f32 %v856_v2, %v855_v60 }
 0x446   :  { %v870_v11 = vadd.f32 %v869_v5, %v868_v4 }
 0x448   :  { %v871_v12 = vsel %vm61_vm3, %v857_v8, %v870_v11 }
 0x449   :  { %1307 = vmatmul.mubr.f32.vlgmr.msra.gmra.mrb[12].mxu1 %v871_v12 }
 0x51c   :  { %v954_v7 = vpop.f32.mrb[12].mxu1 }
 0x51d   :  { %v958_v13 = vmul.f32 0.001953125, %v954_v7  ;;  %v1308_v9 = vpop.f32.mrb[13].mxu1 }
 0x51f   :  { %v959_v16 = vmul.f32 %v958_v13, %v958_v13 }
 0x521   :  { %v961_v20 = vrot.slane %v959_v16, 7 }
 0x523   :  { %v963_v15 = vsub.f32 %v958_v13, %v961_v20 }
 0x525   :  { %v964_v17 = vmax.f32 %v963_v15, 0.0 }
 0x527   :  { %v966_v18 = vadd.f32 1e-05, %v964_v17 }
 0x529   :  { %1406 = vrsqrt.f32 %v966_v18 }
 0x533   :  { %v1407_v19 = vpop.eup %1406 }
 0x534   :  { %v975_v21 = vrot.slane %v1407_v19, %v1693_v63 }
 0x536   :  { %v976_v23 = vcombine.high %v975_v21, %v975_v21 }
 0x538   :  { %v983_v25 = vrot.slane %v976_v23, %v1693_v63 }
 0x53a   :  { %v985_v26 = vmul.f32 %v983_v25, %v965_v24 }
 0x53c   :  { %v987_v28 = vmul.f32 %v985_v26, %v958_v13 }
 0x53e   :  { %v988_v30 = vsub.f32 %v986_v27, %v987_v28 }
 0x540   :  { %v993_v10 = vrot.slane %v988_v30, %v1704_v14 }
 0x542   :  { %v995_v29 = vsel %vm61_vm3, %v985_v26, %v993_v10 }
 0x543   :  { %1312 = vmatmul.mubr.msk.f32.vlgmr.msra.gmra.mrb[12].mxu0 %vm407_vm8, %v995_v29 }
 0x616   :  { %v1066_v52 = vpop.f32.mrb[12].mxu0 }
 0x617   :  { %v1073_v55 = vrot.slane %v1066_v52, %v1704_v14  ;;  %v1313_v58 = vpop.f32.mrb[13].mxu0  ;;  %v1081_v63 = vrot.slane %v1066_v52, %v491_v43 }
 0x619   :  { %v1074_v41 = vmul.f32 %v1073_v55, %v1803_v61  ;;  %v1075_v31 = vmul.f32 %v1073_v55, %v838_v34  ;;  %v1076_v32 = vmul.f32 %v1073_v55, %v843_v40  ;;  %v1077_v33 = vmul.f32 %v1073_v55, %v846_v47 }
 0x61b   :  { %v1082_v0 = vadd.f32 %v1081_v63, %v1074_v41  ;;  %v1083_v35 = vadd.f32 %v1081_v63, %v1075_v31  ;;  %v1084_v36 = vadd.f32 %v1081_v63, %v1076_v32  ;;  %v1085_v3 = vadd.f32 %v1081_v63, %v1077_v33 }
 0x61d   :  { %v1086_v37 = vmax.f32 %v1082_v0, 0.0  ;;  %v1087_v22 = vmax.f32 %v1083_v35, 0.0  ;;  %v1088_v38 = vmax.f32 %v1084_v36, 0.0  ;;  %v1089_v6 = vmax.f32 %v1085_v3, 0.0 }
 0x61f   :  { %1090 = vst [vmem:[%s1845_s9] sm:$0xff] %v1086_v37  ;;  %1091 = vst [vmem:[%s1845_s9 + $0x8] sm:$0xff] %v1087_v22 }
 0x620   :  { %1092 = vst [vmem:[%s1845_s9 + $0x10] sm:$0xff] %v1088_v38  ;;  %1093 = vst [vmem:[%s1845_s9 + $0x18] sm:$0xff] %v1089_v6 }

</bundles_post_ra>
